<compile_context>
chip_gen: v6e
topology: v6e:2x2x1
jax: 0.10.0
libtpu: 0.0.40
codegen_flags: <defaults>
</compile_context>

<pallas_src>
import math
import jax
import jax.numpy as jnp
from jax.experimental import pallas as pl
from jax.experimental.pallas import tpu as pltpu

LANE = 128  # TPU vreg lane width


def _qnet_kernel(x_ref, w1_ref, b1_ref, w2_ref, b2_ref, o_ref):
    """One batch tile: [TB, IN] -> [TB, OUT_PAD]. Weights are VMEM-resident."""
    x = x_ref[...]                                            # [TB, IN] f32
    # MXU matmul 1: cast the activation to the stored weight dtype only at the
    # MXU boundary (no-op for f32 params, bf16 operands if params are bf16);
    # accumulate in f32.
    h = jnp.dot(x.astype(w1_ref.dtype), w1_ref[...],
                preferred_element_type=jnp.float32)           # [TB, HID_PAD]
    # Bias + ReLU in f32 on the VPU (v5e has no bf16 VPU path).
    h = jnp.maximum(h + b1_ref[...], 0.0)
    # MXU matmul 2 (same intentional boundary cast).
    y = jnp.dot(h.astype(w2_ref.dtype), w2_ref[...],
                preferred_element_type=jnp.float32)           # [TB, OUT_PAD]
    o_ref[...] = (y + b2_ref[...]).astype(o_ref.dtype)        # lane-dense store


def prepare_params(w1, b1, w2, b2, *, param_dtype=None):
    """One-time conversion from PyTorch layout to kernel layout.

    w1: [hidden, in], b1: [hidden], w2: [out, hidden], b2: [out]
    Returns weights transposed to (in, hidden_pad) / (hidden_pad, out_pad),
    zero-padded to the 128-lane width, and biases as (1, N) f32 rows.
    Call this ONCE at init / checkpoint load — never per forward call.
    """
    hidden, in_f = w1.shape
    out = w2.shape[0]
    hid_p = max(LANE, ((hidden + LANE - 1) // LANE) * LANE)
    out_p = max(LANE, ((out + LANE - 1) // LANE) * LANE)
    wdt = param_dtype if param_dtype is not None else w1.dtype

    w1_t = jnp.zeros((in_f, hid_p), wdt).at[:, :hidden].set(w1.T.astype(wdt))
    b1_r = jnp.zeros((1, hid_p), jnp.float32).at[:, :hidden].set(b1.astype(jnp.float32))
    w2_t = jnp.zeros((hid_p, out_p), wdt).at[:hidden, :out].set(w2.T.astype(wdt))
    b2_r = jnp.zeros((1, out_p), jnp.float32).at[:, :out].set(b2.astype(jnp.float32))

    return {"w1": w1_t, "b1": b1_r, "w2": w2_t, "b2": b2_r, "out_features": out}


def linear_qnet_forward(x, params, *, tile_b=1024):
    """x: [B, input_size] f32; params: output of prepare_params. Returns [B, out]."""
    w1, b1, w2, b2 = params["w1"], params["b1"], params["w2"], params["b2"]
    out_features = params["out_features"]
    B, in_f = x.shape
    out_p = w2.shape[1]

    # Batch tile: full-extent block for small B (any size is legal when it
    # equals the array dim), otherwise TILE_B (multiple of 8, sized far below
    # v7x's 64 MiB VMEM: ~2*(TB*in + TB*out_p)*4B + weights << 1 MiB at TB=1024).
    tb = B if B <= tile_b else tile_b
    grid = (pl.cdiv(B, tb),)

    # Weights/biases: constant index_map -> single DMA, VMEM-resident across
    # all grid steps. x / output: blocked over the batch axis -> default
    # double-buffered pipeline.
    def const(a):
        return pl.BlockSpec(a.shape, lambda i: (0,) * a.ndim,
                            memory_space=pltpu.VMEM)

    y_pad = pl.pallas_call(
        _qnet_kernel,
        out_shape=jax.ShapeDtypeStruct((B, out_p), x.dtype),
        grid=grid,
        in_specs=[
            pl.BlockSpec((tb, in_f), lambda i: (i, 0), memory_space=pltpu.VMEM),
            const(w1), const(b1), const(w2), const(b2),
        ],
        out_specs=pl.BlockSpec((tb, out_p), lambda i: (i, 0),
                               memory_space=pltpu.VMEM),
        compiler_params=pltpu.CompilerParams(
            dimension_semantics=("parallel",)),   # 2x on v7x megacore
    )(x, w1, b1, w2, b2)

    # Single contiguous slice of the padded Q-value head (128 -> out_features).
    return y_pad[:, :out_features]


def init_linear(key, out_features, in_features, dtype=jnp.float32):
    """Deterministic init mimicking torch.nn.Linear default (uniform ±1/sqrt(fan_in))."""
    kw, kb = jax.random.split(key)
    bound = 1.0 / math.sqrt(in_features)
    w = jax.random.uniform(kw, (out_features, in_features), dtype, -bound, bound)
    b = jax.random.uniform(kb, (out_features,), dtype, -bound, bound)
    return w, b


def reference_forward(x, w1, b1, w2, b2):
    h = jnp.maximum(x @ w1.T + b1, 0.0)
    return h @ w2.T + b2


# TODO(synk): Linear_QNet.save() (host-side torch.save checkpointing) has no
# kernel equivalent and is intentionally not implemented.

if __name__ == "__main__":
    # Snake Q-net sizes: input=11, hidden=32, output=3.
    input_size, hidden_size, output_size = 11, 32, 3

    key = jax.random.PRNGKey(0)
    kx, k1, k2, kx2 = jax.random.split(key, 4)

    w1, b1 = init_linear(k1, hidden_size, input_size)
    w2, b2 = init_linear(k2, output_size, hidden_size)

    # One-time parameter preparation (transpose + lane padding), NOT per call.
    params = prepare_params(w1, b1, w2, b2)

    # 1) Tiny functional check (B=2, like the agent's act() path).
    x_small = jax.random.normal(kx, (2, input_size), jnp.float32)
    out_small = jax.block_until_ready(linear_qnet_forward(x_small, params))
    ref_small = reference_forward(x_small, w1, b1, w2, b2)
    assert out_small.shape == (2, output_size)
    assert jnp.allclose(out_small, ref_small, atol=1e-5, rtol=1e-5), "mismatch (B=2)"

    # 2) Batched check exercising the batch grid + ragged trailing tile.
    x_big = jax.random.normal(kx2, (300, input_size), jnp.float32)
    out_big = jax.block_until_ready(linear_qnet_forward(x_big, params, tile_b=128))
    ref_big = reference_forward(x_big, w1, b1, w2, b2)
    assert out_big.shape == (300, output_size)
    assert jnp.allclose(out_big, ref_big, atol=1e-5, rtol=1e-5), "mismatch (B=300)"

    print("KERNEL_OK")
</pallas_src>

<mosaic_0001>
module attributes {stable_mosaic.version = 11 : i64} {
  func.func @_qnet_kernel(%arg0: i32, %arg1: memref<2x11xf32, #tpu.memory_space<vmem>>, %arg2: memref<11x128xf32, #tpu.memory_space<vmem>>, %arg3: memref<1x128xf32, #tpu.memory_space<vmem>>, %arg4: memref<128x128xf32, #tpu.memory_space<vmem>>, %arg5: memref<1x128xf32, #tpu.memory_space<vmem>>, %arg6: memref<2x128xf32, #tpu.memory_space<vmem>>) attributes {dimension_semantics = [#tpu.dimension_semantics<parallel>], iteration_bounds = array<i64: 1>, scalar_prefetch = 0 : i64, scratch_operands = 0 : i64, tpu.core_type = #tpu.core_type<tc>, window_params = [{transform_indices = @transform_0, window_bounds = array<i64: 2, 11>}, {pipeline_mode = #tpu.pipeline_mode<synchronous>, transform_indices = @transform_1, window_bounds = array<i64: 11, 128>}, {pipeline_mode = #tpu.pipeline_mode<synchronous>, transform_indices = @transform_2, window_bounds = array<i64: 1, 128>}, {pipeline_mode = #tpu.pipeline_mode<synchronous>, transform_indices = @transform_3, window_bounds = array<i64: 128, 128>}, {pipeline_mode = #tpu.pipeline_mode<synchronous>, transform_indices = @transform_4, window_bounds = array<i64: 1, 128>}, {transform_indices = @transform_5, window_bounds = array<i64: 2, 128>}]} {
    %c0 = arith.constant 0 : index
    %c0_0 = arith.constant 0 : index
    %0 = vector.load %arg1[%c0, %c0_0] : memref<2x11xf32, #tpu.memory_space<vmem>>, vector<2x11xf32>
    %c0_1 = arith.constant 0 : index
    %c0_2 = arith.constant 0 : index
    %1 = vector.load %arg2[%c0_1, %c0_2] : memref<11x128xf32, #tpu.memory_space<vmem>>, vector<11x128xf32>
    %cst = arith.constant dense<0.000000e+00> : vector<2x128xf32>
    %2 = tpu.matmul %0, %1, %cst {dimension_numbers = #tpu.dot_dimension_numbers<[1], [0], [0], [1], [0, 0, 1, 1], [], []>} : vector<2x11xf32>, vector<11x128xf32>, vector<2x128xf32> -> vector<2x128xf32>
    %c0_3 = arith.constant 0 : index
    %c0_4 = arith.constant 0 : index
    %3 = vector.load %arg3[%c0_3, %c0_4] : memref<1x128xf32, #tpu.memory_space<vmem>>, vector<1x128xf32>
    %4 = vector.broadcast %3 : vector<1x128xf32> to vector<2x128xf32>
    %5 = arith.addf %2, %4 : vector<2x128xf32>
    %cst_5 = arith.constant 0.000000e+00 : f32
    %6 = vector.broadcast %cst_5 : f32 to vector<2x128xf32>
    %7 = arith.maximumf %5, %6 : vector<2x128xf32>
    %c0_6 = arith.constant 0 : index
    %c0_7 = arith.constant 0 : index
    %8 = vector.load %arg4[%c0_6, %c0_7] : memref<128x128xf32, #tpu.memory_space<vmem>>, vector<128x128xf32>
    %cst_8 = arith.constant dense<0.000000e+00> : vector<2x128xf32>
    %9 = tpu.matmul %7, %8, %cst_8 {dimension_numbers = #tpu.dot_dimension_numbers<[1], [0], [0], [1], [0, 0, 1, 1], [], []>} : vector<2x128xf32>, vector<128x128xf32>, vector<2x128xf32> -> vector<2x128xf32>
    %c0_9 = arith.constant 0 : index
    %c0_10 = arith.constant 0 : index
    %10 = vector.load %arg5[%c0_9, %c0_10] : memref<1x128xf32, #tpu.memory_space<vmem>>, vector<1x128xf32>
    %11 = vector.broadcast %10 : vector<1x128xf32> to vector<2x128xf32>
    %12 = arith.addf %9, %11 : vector<2x128xf32>
    %c0_11 = arith.constant 0 : index
    %c0_12 = arith.constant 0 : index
    %13 = vector.load %arg6[%c0_11, %c0_12] : memref<2x128xf32, #tpu.memory_space<vmem>>, vector<2x128xf32>
    tpu.vector_store %arg6[%c0_11, %c0_12], %12 {strides = array<i32>} : memref<2x128xf32, #tpu.memory_space<vmem>>, vector<2x128xf32>,
    return
  }
  func.func @transform_0(%arg0: i32) -> (i32, i32) {
    %c0_i32 = arith.constant 0 : i32
    %c0_i32_0 = arith.constant 0 : i32
    return %arg0, %c0_i32 : i32, i32
  }
  func.func @transform_1(%arg0: i32) -> (i32, i32) {
    %c0_i32 = arith.constant 0 : i32
    %c0_i32_0 = arith.constant 0 : i32
    %c0_i32_1 = arith.constant 0 : i32
    return %c0_i32, %c0_i32_0 : i32, i32
  }
  func.func @transform_2(%arg0: i32) -> (i32, i32) {
    %c0_i32 = arith.constant 0 : i32
    %c0_i32_0 = arith.constant 0 : i32
    %c0_i32_1 = arith.constant 0 : i32
    return %c0_i32, %c0_i32_0 : i32, i32
  }
  func.func @transform_3(%arg0: i32) -> (i32, i32) {
    %c0_i32 = arith.constant 0 : i32
    %c0_i32_0 = arith.constant 0 : i32
    %c0_i32_1 = arith.constant 0 : i32
    return %c0_i32, %c0_i32_0 : i32, i32
  }
  func.func @transform_4(%arg0: i32) -> (i32, i32) {
    %c0_i32 = arith.constant 0 : i32
    %c0_i32_0 = arith.constant 0 : i32
    %c0_i32_1 = arith.constant 0 : i32
    return %c0_i32, %c0_i32_0 : i32, i32
  }
  func.func @transform_5(%arg0: i32) -> (i32, i32) {
    %c0_i32 = arith.constant 0 : i32
    %c0_i32_0 = arith.constant 0 : i32
    return %arg0, %c0_i32 : i32, i32
  }
}

</mosaic_0001>

<bundles_post_ra>
// kernel: tpu_custom_call.1
= control target key start
LH: loop header
LB: loop body
LE: loop exit
PB: predicated region body
PF: predicated region fallthrough
CT: control target
= control target key end

     0   :  { %10 = vsyncpa [#allocation3], 0  ;;  %s475_s0 = inlined_call_operand.hbm [shape: f32[2,11], index: 0, kind: input, shape index: {}]   ;;  %s476_s1 = inlined_call_operand.hbm [shape: f32[11,128], index: 1, kind: input, shape index: {}]   ;;  %s477_s2 = inlined_call_operand.vmem [shape: f32[1,128], index: 2, kind: input, shape index: {}]   ;;  %s478_s3 = inlined_call_operand.hbm [shape: f32[128,128], index: 3, kind: input, shape index: {}]   ;;  %s479_s4 = inlined_call_operand.vmem [shape: f32[1,128], index: 4, kind: input, shape index: {}]   ;;  %s480_s5 = inlined_call_operand.hbm [shape: f32[2,128], index: 5, kind: output, shape index: {}]  }
   0x1   :  { %11 = vsyncpa [#allocation6], 0 }
   0x2   :  { %12 = vsyncpa [#allocation4], 0  ;;  %s419_s18 = smov [#allocation5]  }
   0x3   :  { %s28_s19 = sshll.u32 %s419_s18, 4  ;;  %s29_s19 = int_to_ptr.vmem [resolvable:$true] %s28_s19 }
   0x4   :  { %s341_s20 = scalar_lea.vmem %s29_s19, 256  ;;  %p346_p1 = scmp.lt.s32.totalorder %s29_s19, %s29_s19 }
   0x5   :  { %p342_p0 = scmp.ne.s32.totalorder %s29_s19, %s341_s20  ;;  %p347_p2 = scmp.lt.s32.totalorder %s341_s20, %s341_s20 }
   0x7   :  { %p348_p3 = por %p347_p2, %p346_p1 }
   0x9   :  { %p349_p4 = pnand %p348_p3, %p342_p0 }
   0xb   :  { %352 = shalt.err (!%p349_p4)
}
   0xc   :  { %s420_s21 = smov 128   ;;  %s421_s22 = smov 8  }
   0xd   :  { %34 = dma.hbm_to_vmem [thread:$0]  %s476_s1, 256, %s29_s19, [#allocation6], %s420_s21, %s420_s21, %s421_s22  }
   0xe   :  { %s422_s25 = smov [#allocation2]   ;;  %s423_s27 = smov [#allocation7]  }
   0xf   :  { %s19_s26 = sshll.u32 %s422_s25, 4  ;;  %s42_s28 = sshll.u32 %s423_s27, 4  ;;  %s20_s26 = int_to_ptr.vmem [resolvable:$true] %s19_s26  ;;  %s43_s28 = int_to_ptr.vmem [resolvable:$true] %s42_s28 }
  0x10   :  { %s361_s29 = scalar_lea.vmem %s20_s26, 32  ;;  %p366_p6 = scmp.lt.s32.totalorder %s20_s26, %s20_s26 }
  0x11   :  { %p362_p5 = scmp.ne.s32.totalorder %s20_s26, %s361_s29  ;;  %p367_p7 = scmp.lt.s32.totalorder %s361_s29, %s361_s29 }
  0x13   :  { %p368_p8 = por %p367_p7, %p366_p6 }
  0x15   :  { %p369_p9 = pnand %p368_p8, %p362_p5 }
  0x17   :  { %372 = shalt.err (!%p369_p9)
}
  0x18   :  { %22 = dma.hbm_to_vmem [thread:$0]  %s475_s0, 32, %s20_s26, [#allocation3]  }
  0x19   :  { %s381_s7 = scalar_lea.vmem %s43_s28, 2048  ;;  %p386_p11 = scmp.lt.s32.totalorder %s43_s28, %s43_s28 }
  0x1a   :  { %p382_p10 = scmp.ne.s32.totalorder %s43_s28, %s381_s7  ;;  %p387_p12 = scmp.lt.s32.totalorder %s381_s7, %s381_s7 }
  0x1c   :  { %p388_p13 = por %p387_p12, %p386_p11 }
  0x1e   :  { %p389_p0 = pnand %p388_p13, %p382_p10 }
  0x20   :  { %392 = shalt.err (!%p389_p0)
}
  0x21   :  { %48 = dma.hbm_to_vmem [thread:$0]  %s478_s3, 2048, %s43_s28, [#allocation6], %s420_s21, %s420_s21, %s421_s22  }
  0x22   :  { %413 = dma.done.wait [#allocation3], 32  }
  0x23   :  { %414 = vsyncadd [#allocation3], 4294967264 }
  0x24   :  { %415 = dma.done.wait [#allocation6], 2304  }
  0x25   :  { %416 = vsyncadd [#allocation6], 4294964992  ;;  %v424_v0 = vmov 0.0   ;;  %vm425_vm0 = vmmov 0   ;;  %vm74_vm1 = vcmask 1042432   ;;  %v61_v2 = vld [vmem:[#allocation5] sm:$0xff] }
  0x26   :  { %283 = vmatprep.subr.mxu0 %v424_v0  ;;  %287 = vmatprep.mubr.msk.f32.mxu0 %vm425_vm0, %v424_v0  ;;  %v62_v1 = vld [vmem:[#allocation5 + $0x8] sm:$0x7]  ;;  %v60_v3 = vld [vmem:[#allocation2] sm:$0x3]  ;;  %vm70_vm2 = vcmask 89088   ;;  %v163_v5 = vld [vmem:[#allocation7 + $0x70] sm:$0xff] }
  0x27   :  { %290 = vmatprep.subr.mxu1 %v424_v0  ;;  %322 = vmatprep.mubr.msk.f32.mxu1 %vm425_vm0, %v424_v0  ;;  %v164_v4 = vld [vmem:[#allocation7 + $0x78] sm:$0xff]  ;;  %v162_v6 = vld [vmem:[#allocation7 + $0x68] sm:$0xff]  ;;  %v161_v7 = vld [vmem:[#allocation7 + $0x60] sm:$0xff]  ;;  %s426_s11 = smov [#allocation8]  }
  0x28   :  { %284 = vmatpush3.msk.msra.mxu0 %vm74_vm1, %v62_v1  ;;  %291 = vmatpush3.msra.mxu1 %v164_v4  ;;  %v160_v8 = vld [vmem:[#allocation7 + $0x58] sm:$0xff]  ;;  %v159_v9 = vld [vmem:[#allocation7 + $0x50] sm:$0xff]  ;;  %v158_v10 = vld [vmem:[#allocation7 + $0x48] sm:$0xff]  ;;  %s249_s12 = sshll.u32 %s426_s11, 4  ;;  %s250_s12 = int_to_ptr.vmem [resolvable:$true] %s249_s12 }
  0x29   :  { %285 = vmatprep.subr.mxu0 %v424_v0  ;;  %292 = vmatprep.subr.mxu1 %v424_v0  ;;  %v157_v11 = vld [vmem:[#allocation7 + $0x40] sm:$0xff]  ;;  %v156_v12 = vld [vmem:[#allocation7 + $0x38] sm:$0xff]  ;;  %v155_v13 = vld [vmem:[#allocation7 + $0x30] sm:$0xff]  ;;  %s393_s13 = scalar_lea.vmem %s250_s12, 32  ;;  %p398_p2 = scmp.lt.s32.totalorder %s250_s12, %s250_s12 }
  0x2a   :  { %286 = vmatpush3.msra.mxu0 %v61_v2  ;;  %293 = vmatpush3.msra.mxu1 %v163_v5  ;;  %v154_v14 = vld [vmem:[#allocation7 + $0x28] sm:$0xff]  ;;  %v153_v15 = vld [vmem:[#allocation7 + $0x20] sm:$0xff]  ;;  %v152_v16 = vld [vmem:[#allocation7 + $0x18] sm:$0xff]  ;;  %p394_p1 = scmp.ne.s32.totalorder %s250_s12, %s393_s13  ;;  %p399_p3 = scmp.lt.s32.totalorder %s393_s13, %s393_s13 }
  0x2b   :  { %288 = vmatmul.mubr.msk.f32.vlgmr.msra.gmra.mxu0 %vm70_vm2, %v60_v3  ;;  %294 = vmatprep.subr.mxu1 %v424_v0  ;;  %v151_v17 = vld [vmem:[#allocation7 + $0x10] sm:$0xff]  ;;  %v150_v18 = vld [vmem:[#allocation7 + $0x8] sm:$0xff]  ;;  %v149_v19 = vld [vmem:[#allocation7] sm:$0xff] }
  0x2c   :  { %295 = vmatpush3.msra.mxu1 %v162_v6  ;;  %v259_v20 = vld [vmem:[%s477_s2] ss:$0 sm:$0xff]  ;;  %p400_p4 = por %p399_p3, %p398_p2 }
  0x2d   :  { %296 = vmatprep.subr.mxu1 %v424_v0  ;;  %v262_v25 = vld [vmem:[%s479_s4] ss:$0 sm:$0xff] }
  0x2e   :  { %297 = vmatpush3.msra.mxu1 %v161_v7  ;;  %p401_p5 = pnand %p400_p4, %p394_p1 }
  0x2f   :  { %298 = vmatprep.subr.mxu1 %v424_v0 }
  0x30   :  { %299 = vmatpush3.msra.mxu1 %v160_v8 }
  0x31   :  { %300 = vmatprep.subr.mxu1 %v424_v0 }
  0x32   :  { %301 = vmatpush3.msra.mxu1 %v159_v9 }
  0x33   :  { %302 = vmatprep.subr.mxu1 %v424_v0 }
  0x34   :  { %303 = vmatpush3.msra.mxu1 %v158_v10 }
  0x35   :  { %304 = vmatprep.subr.mxu1 %v424_v0 }
  0x36   :  { %305 = vmatpush3.msra.mxu1 %v157_v11 }
  0x37   :  { %306 = vmatprep.subr.mxu1 %v424_v0 }
  0x38   :  { %307 = vmatpush3.msra.mxu1 %v156_v12 }
  0x39   :  { %308 = vmatprep.subr.mxu1 %v424_v0 }
  0x3a   :  { %309 = vmatpush3.msra.mxu1 %v155_v13 }
  0x3b   :  { %310 = vmatprep.subr.mxu1 %v424_v0 }
  0x3c   :  { %311 = vmatpush3.msra.mxu1 %v154_v14 }
  0x3d   :  { %312 = vmatprep.subr.mxu1 %v424_v0 }
  0x3e   :  { %313 = vmatpush3.msra.mxu1 %v153_v15 }
  0x3f   :  { %314 = vmatprep.subr.mxu1 %v424_v0 }
  0x40   :  { %315 = vmatpush3.msra.mxu1 %v152_v16 }
  0x41   :  { %316 = vmatprep.subr.mxu1 %v424_v0 }
  0x42   :  { %317 = vmatpush3.msra.mxu1 %v151_v17 }
  0x43   :  { %318 = vmatprep.subr.mxu1 %v424_v0 }
  0x44   :  { %319 = vmatpush3.msra.mxu1 %v150_v18 }
  0x45   :  { %320 = vmatprep.subr.mxu1 %v424_v0 }
  0x46   :  { %321 = vmatpush3.msra.mxu1 %v149_v19 }
  0xeb   :  { %v144_v21 = vpop.f32.mrf.mxu0 }
  0xec   :  { %v145_v22 = vadd.f32 %v259_v20, %v144_v21 }
  0xed   :  { %v289_v23 = vpop.f32.mrf.mxu0 }
  0xee   :  { %v148_v24 = vmax.f32 %v145_v22, 0.0 }
  0xf0   :  { %323 = vmatmul.mubr.f32.vlgmr.msra.gmra.mxu1 %v148_v24 }
 0x1b0   :  { %v238_v26 = vpop.f32.mrf.mxu1 }
 0x1b1   :  { %v239_v27 = vadd.f32 %v262_v25, %v238_v26 }
 0x1b2   :  { %v324_v28 = vpop.f32.mrf.mxu1 }
 0x1b3   :  { %242 = vst [vmem:[#allocation8] sm:$0x3] %v239_v27 }
 0x1b4   :  { %404 = shalt.err (!%p401_p5)
}
 0x1b5   :  { %252 = dma.vmem_to_hbm [thread:$0]  %s250_s12, 32, %s480_s5, [#allocation4]  }
 0x1b6   :  { %417 = dma.done.wait [#allocation4], 32  }
 0x1b7   :  { %418 = vsyncadd [#allocation4], 4294967264 }
 0x1b8   :  { %256 = vsyncpa [#allocation3], 1 }
 0x1b9   :  { %257 = vsyncpa [#allocation6], 1 }
 0x1ba   :  { %258 = vsyncpa [#allocation4], 1 }

</bundles_post_ra>
